<compile_context>
chip_gen: v7x
topology: tpu7x:2x2x1
jax: 0.10.0
libtpu: 0.0.40
codegen_flags: <defaults>
</compile_context>

<pallas_src>
import jax
import jax.numpy as jnp
from jax.experimental import pallas as pl
from jax.experimental.pallas import tpu as pltpu


def _policy_kernel(x_ref, w1_ref, b1_ref, w2_ref, b2_ref, o_ref):
    # hidden layer: (tb, S) @ (S, Hp) + (1, Hp), ReLU
    h = jnp.dot(x_ref[...], w1_ref[...], preferred_element_type=jnp.float32)
    h = jnp.maximum(h + b1_ref[...], 0.0)
    # output layer: (tb, Hp) @ (Hp, Ap) + (1, Ap), tanh
    y = jnp.dot(h, w2_ref[...], preferred_element_type=jnp.float32)
    o_ref[...] = jnp.tanh(y + b2_ref[...]).astype(o_ref.dtype)


def _round_up(x, m):
    return (x + m - 1) // m * m


def policy_forward(state, w1, b1, w2, b2, *, block_b=2048):
    """state: (B, S); w1: (S, H); b1: (H,); w2: (H, A); b2: (A,) -> (B, A)."""
    B, S = state.shape
    H = w1.shape[1]
    A = w2.shape[1]

    # --- lane-pad hidden and action dims to multiples of 128 (zeros) --------
    Hp = _round_up(max(H, 128), 128)
    Ap = _round_up(max(A, 128), 128)
    w1p = jnp.pad(w1, ((0, 0), (0, Hp - H)))
    b1p = jnp.pad(b1, (0, Hp - H)).reshape(1, Hp)
    w2p = jnp.pad(w2, ((0, Hp - H), (0, Ap - A)))
    b2p = jnp.pad(b2, (0, Ap - A)).reshape(1, Ap)

    # --- batch tiling --------------------------------------------------------
    Bp8 = _round_up(B, 8)                      # sublane multiple
    tb = min(_round_up(block_b, 8), Bp8)       # rows per grid step
    Bp = _round_up(Bp8, tb)
    nb = Bp // tb
    xp = jnp.pad(state, ((0, Bp - B), (0, 0))) if Bp != B else state

    out_dtype = state.dtype

    if nb == 1:
        # Single tile: no grid, whole-array VMEM blocks, minimal overhead.
        out_p = pl.pallas_call(
            _policy_kernel,
            out_shape=jax.ShapeDtypeStruct((Bp, Ap), out_dtype),
        )(xp, w1p, b1p, w2p, b2p)
    else:
        # Batched path: 1-D grid over batch tiles; weights/biases resident
        # (constant index_map -> DMA'd once), batch axis parallel for v7x.
        out_p = pl.pallas_call(
            _policy_kernel,
            out_shape=jax.ShapeDtypeStruct((Bp, Ap), out_dtype),
            grid=(nb,),
            in_specs=[
                pl.BlockSpec((tb, S), lambda i: (i, 0)),   # state tile advances
                pl.BlockSpec((S, Hp), lambda i: (0, 0)),   # weights: resident
                pl.BlockSpec((1, Hp), lambda i: (0, 0)),
                pl.BlockSpec((Hp, Ap), lambda i: (0, 0)),
                pl.BlockSpec((1, Ap), lambda i: (0, 0)),
            ],
            out_specs=pl.BlockSpec((tb, Ap), lambda i: (i, 0)),
            compiler_params=pltpu.CompilerParams(
                dimension_semantics=("parallel",),
            ),
        )(xp, w1p, b1p, w2p, b2p)

    return out_p[:B, :A]


def _reference(state, w1, b1, w2, b2):
    h = jnp.maximum(state @ w1 + b1, 0.0)
    return jnp.tanh(h @ w2 + b2)


if __name__ == "__main__":
    # Small shapes consistent with the module's forward.
    batch, state_dim, hidden_dim, action_dim = 8, 16, 32, 8

    key = jax.random.PRNGKey(0)
    k_x, k_w1, k_b1, k_w2, k_b2, k_big = jax.random.split(key, 6)

    state = jax.random.normal(k_x, (batch, state_dim), dtype=jnp.float32)

    # Deterministic parameter init (mimics nn.Linear uniform(-1/sqrt(in), 1/sqrt(in))).
    lim1 = 1.0 / jnp.sqrt(jnp.float32(state_dim))
    lim2 = 1.0 / jnp.sqrt(jnp.float32(hidden_dim))
    # Stored as (in, out) == transpose of PyTorch's (out, in) weight layout.
    w1 = jax.random.uniform(k_w1, (state_dim, hidden_dim), jnp.float32, -lim1, lim1)
    b1 = jax.random.uniform(k_b1, (hidden_dim,), jnp.float32, -lim1, lim1)
    w2 = jax.random.uniform(k_w2, (hidden_dim, action_dim), jnp.float32, -lim2, lim2)
    b2 = jax.random.uniform(k_b2, (action_dim,), jnp.float32, -lim2, lim2)

    # Small-batch path (single tile, no grid).
    out = policy_forward(state, w1, b1, w2, b2)
    jax.block_until_ready(out)
    ref = _reference(state, w1, b1, w2, b2)
    assert out.shape == (batch, action_dim)
    assert jnp.allclose(out, ref, atol=1e-5, rtol=1e-5)

    # Batched path (grid over batch tiles, weights resident across the grid).
    big_batch = 4096 + 40   # exercises padding + multi-tile grid
    state_big = jax.random.normal(k_big, (big_batch, state_dim), dtype=jnp.float32)
    out_big = policy_forward(state_big, w1, b1, w2, b2)
    jax.block_until_ready(out_big)
    ref_big = _reference(state_big, w1, b1, w2, b2)
    assert out_big.shape == (big_batch, action_dim)
    assert jnp.allclose(out_big, ref_big, atol=1e-5, rtol=1e-5)

    print("KERNEL_OK")
</pallas_src>

<mosaic_0001>
module attributes {stable_mosaic.version = 11 : i64} {
  func.func @_policy_kernel(%arg0: memref<8x16xf32, #tpu.memory_space<vmem>>, %arg1: memref<16x128xf32, #tpu.memory_space<vmem>>, %arg2: memref<1x128xf32, #tpu.memory_space<vmem>>, %arg3: memref<128x128xf32, #tpu.memory_space<vmem>>, %arg4: memref<1x128xf32, #tpu.memory_space<vmem>>, %arg5: memref<8x128xf32, #tpu.memory_space<vmem>>) attributes {dimension_semantics = [], scalar_prefetch = 0 : i64, scratch_operands = 0 : i64, tpu.core_type = #tpu.core_type<tc>} {
    %c0 = arith.constant 0 : index
    %c0_0 = arith.constant 0 : index
    %0 = vector.load %arg0[%c0, %c0_0] : memref<8x16xf32, #tpu.memory_space<vmem>>, vector<8x16xf32>
    %c0_1 = arith.constant 0 : index
    %c0_2 = arith.constant 0 : index
    %1 = vector.load %arg1[%c0_1, %c0_2] : memref<16x128xf32, #tpu.memory_space<vmem>>, vector<16x128xf32>
    %cst = arith.constant dense<0.000000e+00> : vector<8x128xf32>
    %2 = tpu.matmul %0, %1, %cst {dimension_numbers = #tpu.dot_dimension_numbers<[1], [0], [0], [1], [0, 0, 1, 1], [], []>} : vector<8x16xf32>, vector<16x128xf32>, vector<8x128xf32> -> vector<8x128xf32>
    %c0_3 = arith.constant 0 : index
    %c0_4 = arith.constant 0 : index
    %3 = vector.load %arg2[%c0_3, %c0_4] : memref<1x128xf32, #tpu.memory_space<vmem>>, vector<1x128xf32>
    %4 = vector.broadcast %3 : vector<1x128xf32> to vector<8x128xf32>
    %5 = arith.addf %2, %4 : vector<8x128xf32>
    %cst_5 = arith.constant 0.000000e+00 : f32
    %6 = vector.broadcast %cst_5 : f32 to vector<8x128xf32>
    %7 = arith.maximumf %5, %6 : vector<8x128xf32>
    %c0_6 = arith.constant 0 : index
    %c0_7 = arith.constant 0 : index
    %8 = vector.load %arg3[%c0_6, %c0_7] : memref<128x128xf32, #tpu.memory_space<vmem>>, vector<128x128xf32>
    %cst_8 = arith.constant dense<0.000000e+00> : vector<8x128xf32>
    %9 = tpu.matmul %7, %8, %cst_8 {dimension_numbers = #tpu.dot_dimension_numbers<[1], [0], [0], [1], [0, 0, 1, 1], [], []>} : vector<8x128xf32>, vector<128x128xf32>, vector<8x128xf32> -> vector<8x128xf32>
    %c0_9 = arith.constant 0 : index
    %c0_10 = arith.constant 0 : index
    %10 = vector.load %arg4[%c0_9, %c0_10] : memref<1x128xf32, #tpu.memory_space<vmem>>, vector<1x128xf32>
    %11 = vector.broadcast %10 : vector<1x128xf32> to vector<8x128xf32>
    %12 = arith.addf %9, %11 : vector<8x128xf32>
    %13 = math.tanh %12 : vector<8x128xf32>
    %c0_11 = arith.constant 0 : index
    %c0_12 = arith.constant 0 : index
    %14 = vector.load %arg5[%c0_11, %c0_12] : memref<8x128xf32, #tpu.memory_space<vmem>>, vector<8x128xf32>
    tpu.vector_store %arg5[%c0_11, %c0_12], %13 {strides = array<i32>} : memref<8x128xf32, #tpu.memory_space<vmem>>, vector<8x128xf32>,
    return
  }
}

</mosaic_0001>

<bundles_post_ra>
// kernel: tpu_custom_call.1
= control target key start
LH: loop header
LB: loop body
LE: loop exit
PB: predicated region body
PF: predicated region fallthrough
CT: control target
= control target key end

     0   :  { %10 = vsyncpa [#allocation3], 0  ;;  %s552_s0 = inlined_call_operand.hbm [shape: f32[8,16], index: 0, kind: input, shape index: {}]   ;;  %s553_s1 = inlined_call_operand.hbm [shape: f32[16,128], index: 1, kind: input, shape index: {}]   ;;  %s554_s2 = inlined_call_operand.vmem [shape: f32[1,128], index: 2, kind: input, shape index: {}]   ;;  %s555_s3 = inlined_call_operand.hbm [shape: f32[128,128], index: 3, kind: input, shape index: {}]   ;;  %s556_s4 = inlined_call_operand.vmem [shape: f32[1,128], index: 4, kind: input, shape index: {}]   ;;  %s557_s5 = inlined_call_operand.hbm [shape: f32[8,128], index: 5, kind: output, shape index: {}]  }
   0x1   :  { %11 = vsyncpa [#allocation6], 0 }
   0x2   :  { %12 = vsyncpa [#allocation4], 0  ;;  %s453_s18 = smov [#allocation5]   ;;  %s359_s22 = scalar_lea.hbm %s553_s1, 256 }
   0x3   :  { %s28_s19 = sshll.u32 %s453_s18, 4  ;;  %p360_p0 = scmp.ne.s32.totalorder %s553_s1, %s359_s22  ;;  %s29_s19 = int_to_ptr.vmem [resolvable:$true] %s28_s19 }
   0x4   :  { %p363_p1 = scmp.lt.u32.totalorder %s359_s22, %s553_s1 }
   0x6   :  { %p365_p2 = pnand %p363_p1, %p360_p0 }
   0x8   :  { %368 = shalt.err (!%p365_p2)
}
   0x9   :  { %s369_s27 = scalar_lea.vmem %s29_s19, 256  ;;  %p374_p4 = scmp.lt.s32.totalorder %s29_s19, %s29_s19 }
   0xa   :  { %p370_p3 = scmp.ne.s32.totalorder %s29_s19, %s369_s27  ;;  %p375_p5 = scmp.lt.s32.totalorder %s369_s27, %s369_s27 }
   0xc   :  { %p376_p6 = por %p375_p5, %p374_p4 }
   0xe   :  { %p377_p7 = pnand %p376_p6, %p370_p3 }
  0x10   :  { %380 = shalt.err (!%p377_p7)
}
  0x11   :  { %s454_s28 = smov 128   ;;  %s455_s29 = smov 8  }
  0x12   :  { %34 = dma.hbm_to_vmem [thread:$0]  %s553_s1, 256, %s29_s19, [#allocation6], %s454_s28, %s454_s28, %s455_s29  }
  0x13   :  { %s456_s7 = smov [#allocation2]   ;;  %s457_s9 = smov [#allocation7]  }
  0x14   :  { %s19_s8 = sshll.u32 %s456_s7, 4  ;;  %s42_s10 = sshll.u32 %s457_s9, 4  ;;  %s20_s8 = int_to_ptr.vmem [resolvable:$true] %s19_s8  ;;  %s43_s10 = int_to_ptr.vmem [resolvable:$true] %s42_s10 }
  0x15   :  { %s381_s13 = scalar_lea.hbm %s552_s0, 128 }
  0x16   :  { %p382_p8 = scmp.ne.s32.totalorder %s552_s0, %s381_s13  ;;  %p385_p9 = scmp.lt.u32.totalorder %s381_s13, %s552_s0 }
  0x18   :  { %p387_p10 = pnand %p385_p9, %p382_p8 }
  0x1a   :  { %390 = shalt.err (!%p387_p10)
}
  0x1b   :  { %s391_s1 = scalar_lea.vmem %s20_s8, 128  ;;  %p396_p12 = scmp.lt.s32.totalorder %s20_s8, %s20_s8 }
  0x1c   :  { %p392_p11 = scmp.ne.s32.totalorder %s20_s8, %s391_s1  ;;  %p397_p13 = scmp.lt.s32.totalorder %s391_s1, %s391_s1 }
  0x1e   :  { %p398_p0 = por %p397_p13, %p396_p12 }
  0x20   :  { %p399_p1 = pnand %p398_p0, %p392_p11 }
  0x22   :  { %402 = shalt.err (!%p399_p1)
}
  0x23   :  { %22 = dma.hbm_to_vmem [thread:$0]  %s552_s0, 128, %s20_s8, [#allocation3]  }
  0x24   :  { %s403_s22 = scalar_lea.hbm %s555_s3, 2048 }
  0x25   :  { %p404_p2 = scmp.ne.s32.totalorder %s555_s3, %s403_s22  ;;  %p407_p3 = scmp.lt.u32.totalorder %s403_s22, %s555_s3 }
  0x27   :  { %p409_p4 = pnand %p407_p3, %p404_p2 }
  0x29   :  { %412 = shalt.err (!%p409_p4)
}
  0x2a   :  { %s413_s27 = scalar_lea.vmem %s43_s10, 2048  ;;  %p418_p6 = scmp.lt.s32.totalorder %s43_s10, %s43_s10 }
  0x2b   :  { %p414_p5 = scmp.ne.s32.totalorder %s43_s10, %s413_s27  ;;  %p419_p7 = scmp.lt.s32.totalorder %s413_s27, %s413_s27 }
  0x2d   :  { %p420_p8 = por %p419_p7, %p418_p6 }
  0x2f   :  { %p421_p9 = pnand %p420_p8, %p414_p5 }
  0x31   :  { %424 = shalt.err (!%p421_p9)
}
  0x32   :  { %48 = dma.hbm_to_vmem [thread:$0]  %s555_s3, 2048, %s43_s10, [#allocation6], %s454_s28, %s454_s28, %s455_s29  }
  0x33   :  { %447 = dma.done.wait [#allocation3], 128  }
  0x34   :  { %448 = vsyncadd [#allocation3], 4294967168 }
  0x35   :  { %449 = dma.done.wait [#allocation6], 2304  }
  0x36   :  { %450 = vsyncadd [#allocation6], 4294964992  ;;  %v458_v0 = vmov 0.0|0.0   ;;  %vm459_vm0 = vmmov 0   ;;  %v460_v1 = vmov 0.0   ;;  %v61_v2 = vld [vmem:[#allocation5] sm:$0xff] }
  0x37   :  { %321 = vmatprep.subr.bf16.mxu0 %v458_v0  ;;  %283 = vmatprep.mubr.msk.f32.mxu0 %vm459_vm0, %v460_v1  ;;  %v62_v3 = vld [vmem:[#allocation5 + $0x8] sm:$0xff]  ;;  %v145_v5 = vld [vmem:[#allocation7] sm:$0xff]  ;;  %v146_v6 = vld [vmem:[#allocation7 + $0x8] sm:$0xff]  ;;  %vm70_vm1 = vcmask 130048   ;;  %s461_s7 = smov [#allocation8]  }
  0x38   :  { %324 = vmatprep.subr.bf16.mxu1 %v458_v0  ;;  %318 = vmatprep.mubr.msk.f32.mxu1 %vm459_vm0, %v460_v1  ;;  %v322_v4 = vpack.c.bf16 %v62_v3, %v61_v2  ;;  %v147_v7 = vld [vmem:[#allocation7 + $0x10] sm:$0xff]  ;;  %v325_v8 = vpack.c.bf16 %v146_v6, %v145_v5  ;;  %v148_v9 = vld [vmem:[#allocation7 + $0x18] sm:$0xff]  ;;  %v60_v10 = vld [vmem:[#allocation2] sm:$0xff]  ;;  %s246_s8 = sshll.u32 %s461_s7, 4  ;;  %s247_s8 = int_to_ptr.vmem [resolvable:$true] %s246_s8 }
  0x39   :  { %v328_v11 = vpack.c.bf16 %v148_v9, %v147_v7  ;;  %v149_v12 = vld [vmem:[#allocation7 + $0x20] sm:$0xff]  ;;  %v150_v13 = vld [vmem:[#allocation7 + $0x28] sm:$0xff]  ;;  %v151_v15 = vld [vmem:[#allocation7 + $0x30] sm:$0xff]  ;;  %s425_s9 = scalar_lea.vmem %s247_s8, 128  ;;  %p430_p11 = scmp.lt.s32.totalorder %s247_s8, %s247_s8 }
  0x3a   :  { %323 = vmatpush3.bf16.msra.mxu0 %v322_v4  ;;  %326 = vmatpush3.bf16.msra.mxu1 %v325_v8  ;;  %v331_v14 = vpack.c.bf16 %v150_v13, %v149_v12  ;;  %v152_v16 = vld [vmem:[#allocation7 + $0x38] sm:$0xff]  ;;  %v153_v18 = vld [vmem:[#allocation7 + $0x40] sm:$0xff]  ;;  %v154_v19 = vld [vmem:[#allocation7 + $0x48] sm:$0xff]  ;;  %p426_p10 = scmp.ne.s32.totalorder %s247_s8, %s425_s9  ;;  %p431_p12 = scmp.lt.s32.totalorder %s425_s9, %s425_s9 }
  0x3b   :  { %327 = vmatprep.subr.bf16.mxu1 %v458_v0  ;;  %v334_v17 = vpack.c.bf16 %v152_v16, %v151_v15  ;;  %v337_v20 = vpack.c.bf16 %v154_v19, %v153_v18  ;;  %v155_v21 = vld [vmem:[#allocation7 + $0x50] sm:$0xff]  ;;  %v156_v22 = vld [vmem:[#allocation7 + $0x58] sm:$0xff]  ;;  %v157_v24 = vld [vmem:[#allocation7 + $0x60] sm:$0xff] }
  0x3c   :  { %v340_v23 = vpack.c.bf16 %v156_v22, %v155_v21  ;;  %v158_v25 = vld [vmem:[#allocation7 + $0x68] sm:$0xff]  ;;  %v159_v27 = vld [vmem:[#allocation7 + $0x70] sm:$0xff]  ;;  %v160_v28 = vld [vmem:[#allocation7 + $0x78] sm:$0xff]  ;;  %p432_p13 = por %p431_p12, %p430_p11 }
  0x3d   :  { %284 = vmatmul.mubr.msk.f32.vlgmr.msra.gmra.mrb[0].mxu0 %vm70_vm1, %v60_v10  ;;  %v343_v26 = vpack.c.bf16 %v158_v25, %v157_v24  ;;  %v346_v29 = vpack.c.bf16 %v160_v28, %v159_v27  ;;  %v256_v30 = vld [vmem:[%s554_s2] ss:$0 sm:$0xff] }
  0x3e   :  { %329 = vmatpush3.bf16.msra.mxu1 %v328_v11  ;;  %v258_v35 = vld [vmem:[%s556_s4] ss:$0 sm:$0xff]  ;;  %p433_p0 = pnand %p432_p13, %p426_p10 }
  0x3f   :  { %330 = vmatprep.subr.bf16.mxu1 %v458_v0 }
  0x42   :  { %332 = vmatpush3.bf16.msra.mxu1 %v331_v14 }
  0x43   :  { %333 = vmatprep.subr.bf16.mxu1 %v458_v0 }
  0x46   :  { %335 = vmatpush3.bf16.msra.mxu1 %v334_v17 }
  0x47   :  { %336 = vmatprep.subr.bf16.mxu1 %v458_v0 }
  0x4a   :  { %338 = vmatpush3.bf16.msra.mxu1 %v337_v20 }
  0x4b   :  { %339 = vmatprep.subr.bf16.mxu1 %v458_v0 }
  0x4e   :  { %341 = vmatpush3.bf16.msra.mxu1 %v340_v23 }
  0x4f   :  { %342 = vmatprep.subr.bf16.mxu1 %v458_v0 }
  0x52   :  { %344 = vmatpush3.bf16.msra.mxu1 %v343_v26 }
  0x53   :  { %345 = vmatprep.subr.bf16.mxu1 %v458_v0 }
  0x56   :  { %347 = vmatpush3.bf16.msra.mxu1 %v346_v29 }
 0x110   :  { %v140_v31 = vpop.f32.mrb[0].mxu0 }
 0x111   :  { %v141_v32 = vadd.f32 %v256_v30, %v140_v31  ;;  %v285_v33 = vpop.f32.mrb[1].mxu0 }
 0x113   :  { %v144_v34 = vmax.f32 %v141_v32, 0.0 }
 0x115   :  { %319 = vmatmul.mubr.f32.vlgmr.msra.gmra.mrb[0].mxu1 %v144_v34 }
 0x1e8   :  { %v234_v36 = vpop.f32.mrb[0].mxu1 }
 0x1e9   :  { %v235_v37 = vadd.f32 %v258_v35, %v234_v36  ;;  %v320_v38 = vpop.f32.mrb[1].mxu1 }
 0x1eb   :  { %357 = vtanh.f32 %v235_v37 }
 0x1f5   :  { %v358_v39 = vpop.eup %357 }
 0x1f6   :  { %239 = vst [vmem:[#allocation8] sm:$0xff] %v358_v39 }
 0x1f7   :  { %436 = shalt.err (!%p433_p0)
}
 0x1f8   :  { %s437_s4 = scalar_lea.hbm %s557_s5, 128 }
 0x1f9   :  { %p438_p1 = scmp.ne.s32.totalorder %s557_s5, %s437_s4  ;;  %p441_p2 = scmp.lt.u32.totalorder %s437_s4, %s557_s5 }
 0x1fb   :  { %p443_p3 = pnand %p441_p2, %p438_p1 }
 0x1fd   :  { %446 = shalt.err (!%p443_p3)
}
 0x1fe   :  { %249 = dma.vmem_to_hbm [thread:$0]  %s247_s8, 128, %s557_s5, [#allocation4]  }
 0x1ff   :  { %451 = dma.done.wait [#allocation4], 128  }
 0x200   :  { %452 = vsyncadd [#allocation4], 4294967168 }
 0x201   :  { %253 = vsyncpa [#allocation3], 1 }
 0x202   :  { %254 = vsyncpa [#allocation6], 1 }
 0x203   :  { %255 = vsyncpa [#allocation4], 1 }

</bundles_post_ra>
